<compile_context>
chip_gen: v6e
topology: v6e:2x2x1
jax: 0.10.0
libtpu: 0.0.40
codegen_flags: <defaults>
</compile_context>

<pallas_src>
import jax
import jax.numpy as jnp
from jax.experimental import pallas as pl
from jax.experimental.pallas import tpu as pltpu


def _identity_dma_kernel(x_hbm_ref, o_hbm_ref, sem):
    # Single HBM->HBM DMA: the DMA engine streams the whole tensor at HBM
    # bandwidth; no VMEM round-trip, no vld/vst work, no grid.
    cp = pltpu.make_async_copy(x_hbm_ref, o_hbm_ref, sem)
    cp.start()
    cp.wait()


def _identity_copy(x):
    """Materialize a fresh buffer equal to x via one HBM->HBM DMA."""
    squeeze_back = False
    if x.ndim == 0:
        # Keep the DMA operating on a >=1-D ref; metadata-only reshape.
        x = x.reshape(1)
        squeeze_back = True

    nbytes = x.size * jnp.dtype(x.dtype).itemsize

    y = pl.pallas_call(
        _identity_dma_kernel,
        out_shape=jax.ShapeDtypeStruct(x.shape, x.dtype),
        in_specs=[pl.BlockSpec(memory_space=pl.ANY)],
        out_specs=pl.BlockSpec(memory_space=pl.ANY),
        scratch_shapes=[pltpu.SemaphoreType.DMA(())],
        compiler_params=pltpu.CompilerParams(has_side_effects=True),
        # Purely memory-bound custom call: read N bytes, write N bytes.
        cost_estimate=pl.CostEstimate(
            flops=0, transcendentals=0, bytes_accessed=2 * nbytes
        ),
    )(x)

    if squeeze_back:
        y = y.reshape(())
    return y


def identity(x, copy=False):
    """Pallas implementation of Identity.forward: returns x unchanged.

    copy=False (default): returns x itself — no kernel, no HBM traffic.
    copy=True:            returns a distinct buffer with identical contents,
                          produced by a single HBM->HBM DMA kernel.
    """
    if not copy:
        # Identity is a zero-work op; any kernel here would pay a full
        # read+write of the tensor through HBM for nothing.
        return x

    if x.size == 0:
        # Nothing to DMA; a zero-size fresh buffer is free.
        return jnp.empty(x.shape, x.dtype)

    return _identity_copy(x)


if __name__ == "__main__":
    key = jax.random.PRNGKey(0)
    k0, k1 = jax.random.split(key)

    # Shape consistent with the module's typical NCHW usage.
    x = jax.random.normal(k0, (2, 4, 16, 16), dtype=jnp.float32)

    # Default (optimal) path: no kernel at all.
    y_fast = identity(x)

    # Fresh-buffer path: gridless HBM->HBM DMA Pallas kernel.
    y_copy = identity(x, copy=True)

    # Ragged / non-128-multiple, non-f32 shape goes through the same DMA path
    # with no padding or slicing passes.
    z = jax.random.normal(k1, (3, 5, 7), dtype=jnp.bfloat16)
    z_copy = identity(z, copy=True)

    jax.block_until_ready((y_fast, y_copy, z_copy))

    assert y_fast.shape == x.shape and y_fast.dtype == x.dtype
    assert y_copy.shape == x.shape and y_copy.dtype == x.dtype
    assert z_copy.shape == z.shape and z_copy.dtype == z.dtype
    assert bool(jnp.array_equal(y_fast, x))
    assert bool(jnp.array_equal(y_copy, x))
    assert bool(jnp.array_equal(z_copy, z))
    print("KERNEL_OK")
</pallas_src>

<mosaic_0001>
module attributes {stable_mosaic.version = 11 : i64} {
  func.func @_identity_dma_kernel(%arg0: memref<2x4x16x16xf32, #tpu.memory_space<any>>, %arg1: memref<2x4x16x16xf32, #tpu.memory_space<any>>, %arg2: memref<!tpu.dma_semaphore, #tpu.memory_space<semaphore_mem>>) attributes {dimension_semantics = [], scalar_prefetch = 0 : i64, scratch_operands = 1 : i64, tpu.core_type = #tpu.core_type<tc>} {
    tpu.enqueue_dma source(%arg0 : memref<2x4x16x16xf32, #tpu.memory_space<any>>) target(%arg1 : memref<2x4x16x16xf32, #tpu.memory_space<any>>) target_semaphore(%arg2 : memref<!tpu.dma_semaphore, #tpu.memory_space<semaphore_mem>>)
    tpu.wait_dma2 semaphore(%arg2 : memref<!tpu.dma_semaphore, #tpu.memory_space<semaphore_mem>>) src(%arg0 : memref<2x4x16x16xf32, #tpu.memory_space<any>>) dst(%arg1 : memref<2x4x16x16xf32, #tpu.memory_space<any>>)
    return
  }
}

</mosaic_0001>

<bundles_post_ra>
// kernel: tpu_custom_call.1
= control target key start
LH: loop header
LB: loop body
LE: loop exit
PB: predicated region body
PF: predicated region fallthrough
CT: control target
= control target key end

     0   :  { %s30_s6 = smov [#allocation2]   ;;  %s31_s7 = smov 131072   ;;  %s49_s0 = inlined_call_operand.hbm [shape: f32[2,4,16,16], index: 0, kind: input, shape index: {}]   ;;  %s50_s1 = inlined_call_operand.hbm [shape: f32[2,4,16,16], index: 1, kind: output, shape index: {}]  }
   0x1   :  { %s32_s8 = smov 0  }
   0x2   :  { %12 = dma.general %s49_s0, 2048, %s50_s1, %s30_s6, %s31_s7, [#allocation4], %s32_s8, 0  }
   0x3   :  { %28 = dma.done.wait [#allocation2], 2048 }
   0x4   :  { %29 = vsyncadd [#allocation2], 4294965248 }
   0x5   :  { %18 = vsyncmov [#allocation2] }
   0x8   :  { %s19_s13 = vpop.sfrf %18 }
   0x9   :  { %p24_p0 = scmp.ne.s32.totalorder %s19_s13, 0 }
   0xb   :  { %23 = shalt.err (%p24_p0)  }

</bundles_post_ra>
